<compile_context>
chip_gen: v5e
topology: v5e:2x2
jax: 0.10.0
libtpu: 0.0.40
codegen_flags: <defaults>
</compile_context>

<pallas_src>
import functools

import jax
import jax.numpy as jnp
from jax.experimental import pallas as pl
from jax.experimental.pallas import tpu as pltpu

# --- model hyper-parameters (from GeoLocalizationNet / NetVLAD __init__) ---
FEATURES_DIM = 256     # resnet18conv4 output channels == NetVLAD dim
CLUSTERS_NUM = 64      # NetVLAD clusters
CLUSTERS_PAD = 128     # lane-dense padded cluster axis inside the kernel
PATCH = 16             # stride-16 downsample, same as resnet18conv4 spatial stride
EPS = 1e-12            # F.normalize eps
NEG_INF = -1e30        # additive mask for padded cluster lanes


def _round_up(x, m):
    return (x + m - 1) // m * m


def geoloc_kernel(patches_ref, wb_ref, bb_ref, wc_ref, cmask_ref,
                  vlad_ref, asum_ref, *, s_total, s_padded, ts):
    """Grid = (N, NC, n_s): image n, core-partition c, spatial tile s.

    patches_ref: (1, TS, Cp)   bf16  flattened image patches (one spatial tile)
    wb_ref:      (Cp, D)       bf16  backbone patch-embed weight
    bb_ref:      (1, D)        f32   backbone bias
    wc_ref:      (D, Kp)       bf16  NetVLAD 1x1-conv weight (transposed, padded)
    cmask_ref:   (1, Kp)       f32   additive cluster mask (0 real / -1e30 pad)
    vlad_ref:    (1, 1, D, Kp) f32   out: partial  sum_s xn[s,d] * a[s,k]
    asum_ref:    (1, 1, 1, Kp) f32   out: partial  sum_s a[s,k]
    """
    s_idx = pl.program_id(2)

    @pl.when(s_idx == 0)
    def _init():
        vlad_ref[...] = jnp.zeros_like(vlad_ref)
        asum_ref[...] = jnp.zeros_like(asum_ref)

    patches = patches_ref[0]                                         # (TS, Cp) bf16

    # --- backbone stand-in: patch-embedding conv + ReLU -> (TS, D) f32 ---
    feat = jnp.dot(patches, wb_ref[...],
                   preferred_element_type=jnp.float32) + bb_ref[...]
    feat = jnp.maximum(feat, 0.0)

    # --- NetVLAD ---
    # descriptor-wise L2 norm: x / max(||x||, eps) == x * rsqrt(max(||x||^2, eps^2))
    sumsq = jnp.sum(feat * feat, axis=-1, keepdims=True)
    xn = feat * jax.lax.rsqrt(jnp.maximum(sumsq, EPS * EPS))         # (TS, D) f32
    xn_b = xn.astype(jnp.bfloat16)

    # soft assignment: softmax over the (lane-dense, padded) cluster axis.
    # No max-subtraction: xn rows are unit-norm and wc columns have small norm,
    # so real logits stay O(1); exp(NEG_INF) == 0 exactly for pad lanes.
    logits = jnp.dot(xn_b, wc_ref[...],
                     preferred_element_type=jnp.float32) + cmask_ref[...]
    e = jnp.exp(logits)
    a = e * pl.reciprocal(jnp.sum(e, axis=-1, keepdims=True), approx=True)

    if s_padded != s_total:
        # zero contributions from zero-padded spatial rows (tail tiles only)
        row0 = (pl.program_id(1) * pl.num_programs(2) + s_idx) * ts
        row = row0 + jax.lax.broadcasted_iota(jnp.int32, (ts, 1), 0)
        a = jnp.where(row < s_total, a, 0.0)

    # vlad^T[d, k] += sum_s xn[s, d] * a[s, k]   (dim-0 contraction -> MXU,
    # no XLU transpose of either operand)
    vlad_ref[0, 0] += jax.lax.dot_general(
        xn_b, a.astype(jnp.bfloat16),
        dimension_numbers=(((0,), (0,)), ((), ())),
        preferred_element_type=jnp.float32)
    asum_ref[0, 0] += jnp.sum(a, axis=0, keepdims=True)              # (1, Kp)


def init_params(key, c_in=3):
    cp = c_in * PATCH * PATCH
    k_wb, k_wc, k_cent = jax.random.split(key, 3)
    wb = jax.random.normal(k_wb, (cp, FEATURES_DIM), jnp.float32) * 0.02
    bb = jnp.zeros((1, FEATURES_DIM), jnp.float32)
    # nn.Conv2d(dim, clusters, 1, bias=False) default init ~ U(-1/sqrt(D), 1/sqrt(D))
    bound = 1.0 / jnp.sqrt(float(FEATURES_DIM))
    wc = jax.random.uniform(k_wc, (FEATURES_DIM, CLUSTERS_NUM), jnp.float32,
                            minval=-bound, maxval=bound)
    # centroids = torch.rand(K, D) -> U[0, 1)
    centroids = jax.random.uniform(k_cent, (CLUSTERS_NUM, FEATURES_DIM), jnp.float32)
    return dict(wb=wb, bb=bb, wc=wc, centroids=centroids)


@functools.partial(jax.jit, static_argnames=("max_tile",))
def geolocalization_forward(x, params, *, max_tile=512):
    """x: (N, C, H, W) float32 NCHW -> (N, K*D) float32 (cluster-major)."""
    N, C, H, W = x.shape
    Hp, Wp = H // PATCH, W // PATCH
    S = Hp * Wp
    Cp = C * PATCH * PATCH
    D, K, Kp = FEATURES_DIM, CLUSTERS_NUM, CLUSTERS_PAD

    # glue: bf16 patch extraction (single XLA convert+transpose fusion; the
    # kernel additionally allows XLA to fuse this producer into its input DMA)
    xb = x.astype(jnp.bfloat16)
    patches = xb.reshape(N, C, Hp, PATCH, Wp, PATCH)
    patches = patches.transpose(0, 2, 4, 1, 3, 5).reshape(N, S, Cp)

    # spatial tiling: TS multiple of 16 (bf16 sublane), capped at max_tile;
    # NC = 2 splits the reduction across both v7x TensorCores at batch 1.
    TS = min(max_tile, _round_up(S, 16))
    n_tiles = pl.cdiv(S, TS)
    NC = 2 if (N == 1 and n_tiles >= 2) else 1
    n_s = pl.cdiv(n_tiles, NC)
    S_pad = NC * n_s * TS
    if S_pad != S:
        patches = jnp.pad(patches, ((0, 0), (0, S_pad - S), (0, 0)))

    # params: bf16 MXU operands, lane-dense (padded-to-128) cluster axis
    wb = params["wb"].astype(jnp.bfloat16)                               # (Cp, D)
    bb = params["bb"].astype(jnp.float32).reshape(1, D)                  # (1, D)
    wc = jnp.pad(params["wc"].astype(jnp.bfloat16), ((0, 0), (0, Kp - K)))  # (D, Kp)
    cmask = jnp.concatenate([jnp.zeros((1, K), jnp.float32),
                             jnp.full((1, Kp - K), NEG_INF, jnp.float32)], axis=1)

    kernel = functools.partial(geoloc_kernel, s_total=S, s_padded=S_pad, ts=TS)

    flops = 2 * N * S_pad * (Cp * D + 2 * D * Kp)
    bytes_accessed = (N * S_pad * Cp * 2 + N * NC * (D + 1) * Kp * 4
                      + Cp * D * 2 + D * Kp * 2 + (D + Kp) * 4)
    transcendentals = N * S_pad * (Kp + 3)

    # deeper input pipelining only when the grid is long enough to benefit
    patch_spec_kwargs = {}
    if N * NC * n_s >= 4:
        patch_spec_kwargs["pipeline_mode"] = pl.Buffered(3)

    vlad_p, asum_p = pl.pallas_call(
        kernel,
        out_shape=(jax.ShapeDtypeStruct((N, NC, D, Kp), jnp.float32),
                   jax.ShapeDtypeStruct((N, NC, 1, Kp), jnp.float32)),
        grid=(N, NC, n_s),
        in_specs=[
            pl.BlockSpec((1, TS, Cp), lambda n, c, s: (n, c * n_s + s, 0),
                         **patch_spec_kwargs),
            pl.BlockSpec((Cp, D), lambda n, c, s: (0, 0)),
            pl.BlockSpec((1, D), lambda n, c, s: (0, 0)),
            pl.BlockSpec((D, Kp), lambda n, c, s: (0, 0)),
            pl.BlockSpec((1, Kp), lambda n, c, s: (0, 0)),
        ],
        out_specs=[
            pl.BlockSpec((1, 1, D, Kp), lambda n, c, s: (n, c, 0, 0)),
            pl.BlockSpec((1, 1, 1, Kp), lambda n, c, s: (n, c, 0, 0)),
        ],
        compiler_params=pltpu.CompilerParams(
            dimension_semantics=("parallel", "parallel", "arbitrary"),
            vmem_limit_bytes=32 * 1024 * 1024,
            allow_input_fusion=[True, False, False, False, False]),
        cost_estimate=pl.CostEstimate(flops=int(flops),
                                      transcendentals=int(transcendentals),
                                      bytes_accessed=int(bytes_accessed)),
    )(patches, wb, bb, wc, cmask)

    # tiny O(N*K*D) f32 epilogue: combine per-core partials, centroid subtract,
    # intra-normalize per cluster, flatten cluster-major, global L2 normalize.
    vladt = jnp.sum(vlad_p, axis=1)                          # (N, D, Kp)
    asum = jnp.sum(asum_p, axis=1)[:, 0, :]                  # (N, Kp)
    vlad = vladt[:, :, :K].transpose(0, 2, 1)                # (N, K, D)
    vlad = vlad - asum[:, :K, None] * params["centroids"].astype(jnp.float32)[None]
    vlad = vlad * jax.lax.rsqrt(
        jnp.maximum(jnp.sum(vlad * vlad, axis=-1, keepdims=True), EPS * EPS))
    vlad = vlad.reshape(N, K * D)
    vlad = vlad * jax.lax.rsqrt(
        jnp.maximum(jnp.sum(vlad * vlad, axis=-1, keepdims=True), EPS * EPS))
    return vlad


def _reference_forward(x, params):
    """Plain-JAX f32 reference mirroring the PyTorch semantics (for verification)."""
    N, C, H, W = x.shape
    Hp, Wp = H // PATCH, W // PATCH
    S, Cp = Hp * Wp, C * PATCH * PATCH
    patches = x.reshape(N, C, Hp, PATCH, Wp, PATCH)
    patches = patches.transpose(0, 2, 4, 1, 3, 5).reshape(N, S, Cp)
    feat = jnp.maximum(patches @ params["wb"] + params["bb"], 0.0)        # (N,S,D)
    xn = feat / jnp.maximum(jnp.linalg.norm(feat, axis=-1, keepdims=True), EPS)
    a = jax.nn.softmax(xn @ params["wc"], axis=-1)                        # (N,S,K)
    vlad = jnp.einsum("nsk,nsd->nkd", a, xn) \
        - jnp.sum(a, axis=1)[..., None] * params["centroids"][None]
    vlad = vlad / jnp.maximum(jnp.linalg.norm(vlad, axis=-1, keepdims=True), EPS)
    vlad = vlad.reshape(N, -1)
    vlad = vlad / jnp.maximum(jnp.linalg.norm(vlad, axis=-1, keepdims=True), EPS)
    return vlad


if __name__ == "__main__":
    key = jax.random.PRNGKey(0)
    k_x1, k_x2, k_p = jax.random.split(key, 3)
    params = init_params(k_p, c_in=3)

    # Test 1: batch=2, 3x64x64 -> 4x4 feature map, single spatial tile per image.
    x1 = jax.random.normal(k_x1, (2, 3, 64, 64), jnp.float32)
    out1 = jax.block_until_ready(geolocalization_forward(x1, params))
    ref1 = _reference_forward(x1, params)
    assert out1.shape == (2, CLUSTERS_NUM * FEATURES_DIM), out1.shape
    err1 = float(jnp.max(jnp.abs(out1 - ref1)))
    assert err1 < 5e-3, f"test1 mismatch vs reference: max abs err {err1}"

    # Test 2: batch=1, 3x64x160 with a small tile cap -> exercises the two-core
    # S split (NC=2), multi-tile accumulation, spatial-pad masking and Buffered(3).
    x2 = jax.random.normal(k_x2, (1, 3, 64, 160), jnp.float32)
    out2 = jax.block_until_ready(geolocalization_forward(x2, params, max_tile=16))
    ref2 = _reference_forward(x2, params)
    assert out2.shape == (1, CLUSTERS_NUM * FEATURES_DIM), out2.shape
    err2 = float(jnp.max(jnp.abs(out2 - ref2)))
    assert err2 < 5e-3, f"test2 mismatch vs reference: max abs err {err2}"

    print("KERNEL_OK")
</pallas_src>

<mosaic_0001>
module attributes {stable_mosaic.version = 11 : i64} {
  func.func @geoloc_kernel(%arg0: i32, %arg1: i32, %arg2: i32, %arg3: memref<1x16x768xbf16, #tpu.memory_space<vmem>>, %arg4: memref<768x256xbf16, #tpu.memory_space<vmem>>, %arg5: memref<1x256xf32, #tpu.memory_space<vmem>>, %arg6: memref<256x128xbf16, #tpu.memory_space<vmem>>, %arg7: memref<1x128xf32, #tpu.memory_space<vmem>>, %arg8: memref<1x1x256x128xf32, #tpu.memory_space<vmem>>, %arg9: memref<1x1x1x128xf32, #tpu.memory_space<vmem>>) attributes {dimension_semantics = [#tpu.dimension_semantics<parallel>, #tpu.dimension_semantics<parallel>, #tpu.dimension_semantics<arbitrary>], iteration_bounds = array<i64: 2, 1, 1>, scalar_prefetch = 0 : i64, scratch_operands = 0 : i64, tpu.core_type = #tpu.core_type<tc>, window_params = [{transform_indices = @transform_0, window_bounds = array<i64: 1, 16, 768>}, {pipeline_mode = #tpu.pipeline_mode<synchronous>, transform_indices = @transform_1, window_bounds = array<i64: 768, 256>}, {pipeline_mode = #tpu.pipeline_mode<synchronous>, transform_indices = @transform_2, window_bounds = array<i64: 1, 256>}, {pipeline_mode = #tpu.pipeline_mode<synchronous>, transform_indices = @transform_3, window_bounds = array<i64: 256, 128>}, {pipeline_mode = #tpu.pipeline_mode<synchronous>, transform_indices = @transform_4, window_bounds = array<i64: 1, 128>}, {transform_indices = @transform_5, window_bounds = array<i64: 1, 1, 256, 128>}, {transform_indices = @transform_6, window_bounds = array<i64: 1, 1, 1, 128>}]} {
    %c0_i32 = arith.constant 0 : i32
    %0 = arith.cmpi eq, %arg2, %c0_i32 : i32
    %1 = arith.extui %0 : i1 to i32
    %c0_i32_0 = arith.constant 0 : i32
    %2 = arith.cmpi ne, %1, %c0_i32_0 : i32
    scf.if %2 {
      %cst_34 = arith.constant 0.000000e+00 : f32
      %48 = vector.broadcast %cst_34 : f32 to vector<1x1x256x128xf32>
      %c0_35 = arith.constant 0 : index
      %c0_36 = arith.constant 0 : index
      %c0_37 = arith.constant 0 : index
      %c0_38 = arith.constant 0 : index
      %49 = vector.load %arg8[%c0_35, %c0_36, %c0_37, %c0_38] : memref<1x1x256x128xf32, #tpu.memory_space<vmem>>, vector<1x1x256x128xf32>
      tpu.vector_store %arg8[%c0_35, %c0_36, %c0_37, %c0_38], %48 {strides = array<i32>} : memref<1x1x256x128xf32, #tpu.memory_space<vmem>>, vector<1x1x256x128xf32>,
      %cst_39 = arith.constant 0.000000e+00 : f32
      %50 = vector.broadcast %cst_39 : f32 to vector<1x1x1x128xf32>
      %c0_40 = arith.constant 0 : index
      %c0_41 = arith.constant 0 : index
      %c0_42 = arith.constant 0 : index
      %c0_43 = arith.constant 0 : index
      %51 = vector.load %arg9[%c0_40, %c0_41, %c0_42, %c0_43] : memref<1x1x1x128xf32, #tpu.memory_space<vmem>>, vector<1x1x1x128xf32>
      tpu.vector_store %arg9[%c0_40, %c0_41, %c0_42, %c0_43], %50 {strides = array<i32>} : memref<1x1x1x128xf32, #tpu.memory_space<vmem>>, vector<1x1x1x128xf32>,
    } else {
    }
    %c0 = arith.constant 0 : index
    %c0_1 = arith.constant 0 : index
    %c0_2 = arith.constant 0 : index
    %3 = vector.load %arg3[%c0, %c0_1, %c0_2] : memref<1x16x768xbf16, #tpu.memory_space<vmem>>, vector<1x16x768xbf16>
    %4 = vector.shape_cast %3 : vector<1x16x768xbf16> to vector<16x768xbf16>
    %c0_3 = arith.constant 0 : index
    %c0_4 = arith.constant 0 : index
    %5 = vector.load %arg4[%c0_3, %c0_4] : memref<768x256xbf16, #tpu.memory_space<vmem>>, vector<768x256xbf16>
    %cst = arith.constant dense<0.000000e+00> : vector<16x256xf32>
    %6 = tpu.matmul %4, %5, %cst {dimension_numbers = #tpu.dot_dimension_numbers<[1], [0], [0], [1], [0, 0, 1, 1], [], []>} : vector<16x768xbf16>, vector<768x256xbf16>, vector<16x256xf32> -> vector<16x256xf32>
    %c0_5 = arith.constant 0 : index
    %c0_6 = arith.constant 0 : index
    %7 = vector.load %arg5[%c0_5, %c0_6] : memref<1x256xf32, #tpu.memory_space<vmem>>, vector<1x256xf32>
    %8 = vector.broadcast %7 : vector<1x256xf32> to vector<16x256xf32>
    %9 = arith.addf %6, %8 : vector<16x256xf32>
    %cst_7 = arith.constant 0.000000e+00 : f32
    %10 = vector.broadcast %cst_7 : f32 to vector<16x256xf32>
    %11 = arith.maximumf %9, %10 : vector<16x256xf32>
    %12 = arith.mulf %11, %11 : vector<16x256xf32>
    %cst_8 = arith.constant dense<0.000000e+00> : vector<16xf32>
    %13 = vector.multi_reduction <add>, %12, %cst_8 [1] : vector<16x256xf32> to vector<16xf32>
    %14 = vector.shape_cast %13 : vector<16xf32> to vector<16x1xf32>
    %cst_9 = arith.constant 1.000000e-24 : f32
    %15 = vector.broadcast %cst_9 : f32 to vector<16x1xf32>
    %16 = arith.maximumf %14, %15 : vector<16x1xf32>
    %17 = math.rsqrt %16 : vector<16x1xf32>
    %18 = vector.broadcast %17 : vector<16x1xf32> to vector<16x256xf32>
    %19 = arith.mulf %11, %18 : vector<16x256xf32>
    %20 = arith.truncf %19 : vector<16x256xf32> to vector<16x256xbf16>
    %c0_10 = arith.constant 0 : index
    %c0_11 = arith.constant 0 : index
    %21 = vector.load %arg6[%c0_10, %c0_11] : memref<256x128xbf16, #tpu.memory_space<vmem>>, vector<256x128xbf16>
    %cst_12 = arith.constant dense<0.000000e+00> : vector<16x128xf32>
    %22 = tpu.matmul %20, %21, %cst_12 {dimension_numbers = #tpu.dot_dimension_numbers<[1], [0], [0], [1], [0, 0, 1, 1], [], []>} : vector<16x256xbf16>, vector<256x128xbf16>, vector<16x128xf32> -> vector<16x128xf32>
    %c0_13 = arith.constant 0 : index
    %c0_14 = arith.constant 0 : index
    %23 = vector.load %arg7[%c0_13, %c0_14] : memref<1x128xf32, #tpu.memory_space<vmem>>, vector<1x128xf32>
    %24 = vector.broadcast %23 : vector<1x128xf32> to vector<16x128xf32>
    %25 = arith.addf %22, %24 : vector<16x128xf32>
    %26 = math.exp %25 : vector<16x128xf32>
    %cst_15 = arith.constant dense<0.000000e+00> : vector<16xf32>
    %27 = vector.multi_reduction <add>, %26, %cst_15 [1] : vector<16x128xf32> to vector<16xf32>
    %28 = vector.shape_cast %27 : vector<16xf32> to vector<16x1xf32>
    %29 = tpu.reciprocal %28 {approx = true} : vector<16x1xf32> -> vector<16x1xf32>
    %30 = vector.broadcast %29 : vector<16x1xf32> to vector<16x128xf32>
    %31 = arith.mulf %26, %30 : vector<16x128xf32>
    %c0_16 = arith.constant 0 : index
    %c0_17 = arith.constant 0 : index
    %c0_18 = arith.constant 0 : index
    %c0_19 = arith.constant 0 : index
    %32 = vector.load %arg8[%c0_16, %c0_17, %c0_18, %c0_19] : memref<1x1x256x128xf32, #tpu.memory_space<vmem>>, vector<1x1x256x128xf32>
    %33 = vector.shape_cast %32 : vector<1x1x256x128xf32> to vector<256x128xf32>
    %34 = arith.truncf %31 : vector<16x128xf32> to vector<16x128xbf16>
    %cst_20 = arith.constant dense<0.000000e+00> : vector<256x128xf32>
    %35 = tpu.matmul %20, %34, %cst_20 {dimension_numbers = #tpu.dot_dimension_numbers<[0], [0], [1], [1], [0, 1, 1, 1], [], []>} : vector<16x256xbf16>, vector<16x128xbf16>, vector<256x128xf32> -> vector<256x128xf32>
    %36 = arith.addf %33, %35 : vector<256x128xf32>
    %c0_21 = arith.constant 0 : index
    %c0_22 = arith.constant 0 : index
    %c0_23 = arith.constant 0 : index
    %c0_24 = arith.constant 0 : index
    %37 = vector.load %arg8[%c0_21, %c0_22, %c0_23, %c0_24] : memref<1x1x256x128xf32, #tpu.memory_space<vmem>>, vector<1x1x256x128xf32>
    %38 = vector.shape_cast %37 : vector<1x1x256x128xf32> to vector<256x128xf32>
    %39 = vector.shape_cast %36 : vector<256x128xf32> to vector<1x1x256x128xf32>
    tpu.vector_store %arg8[%c0_21, %c0_22, %c0_23, %c0_24], %39 {strides = array<i32>} : memref<1x1x256x128xf32, #tpu.memory_space<vmem>>, vector<1x1x256x128xf32>,
    %c0_25 = arith.constant 0 : index
    %c0_26 = arith.constant 0 : index
    %c0_27 = arith.constant 0 : index
    %c0_28 = arith.constant 0 : index
    %40 = vector.load %arg9[%c0_25, %c0_26, %c0_27, %c0_28] : memref<1x1x1x128xf32, #tpu.memory_space<vmem>>, vector<1x1x1x128xf32>
    %41 = vector.shape_cast %40 : vector<1x1x1x128xf32> to vector<1x128xf32>
    %cst_29 = arith.constant dense<0.000000e+00> : vector<128xf32>
    %42 = vector.multi_reduction <add>, %31, %cst_29 [0] : vector<16x128xf32> to vector<128xf32>
    %43 = vector.shape_cast %42 : vector<128xf32> to vector<1x128xf32>
    %44 = arith.addf %41, %43 : vector<1x128xf32>
    %c0_30 = arith.constant 0 : index
    %c0_31 = arith.constant 0 : index
    %c0_32 = arith.constant 0 : index
    %c0_33 = arith.constant 0 : index
    %45 = vector.load %arg9[%c0_30, %c0_31, %c0_32, %c0_33] : memref<1x1x1x128xf32, #tpu.memory_space<vmem>>, vector<1x1x1x128xf32>
    %46 = vector.shape_cast %45 : vector<1x1x1x128xf32> to vector<1x128xf32>
    %47 = vector.shape_cast %44 : vector<1x128xf32> to vector<1x1x1x128xf32>
    tpu.vector_store %arg9[%c0_30, %c0_31, %c0_32, %c0_33], %47 {strides = array<i32>} : memref<1x1x1x128xf32, #tpu.memory_space<vmem>>, vector<1x1x1x128xf32>,
    return
  }
  func.func @transform_0(%arg0: i32, %arg1: i32, %arg2: i32) -> (i32, i32, i32) {
    %c1_i32 = arith.constant 1 : i32
    %0 = arith.muli %arg1, %c1_i32 : i32
    %1 = arith.addi %0, %arg2 : i32
    %c0_i32 = arith.constant 0 : i32
    %c0_i32_0 = arith.constant 0 : i32
    return %arg0, %1, %c0_i32 : i32, i32, i32
  }
  func.func @transform_1(%arg0: i32, %arg1: i32, %arg2: i32) -> (i32, i32) {
    %c0_i32 = arith.constant 0 : i32
    %c0_i32_0 = arith.constant 0 : i32
    %c0_i32_1 = arith.constant 0 : i32
    return %c0_i32, %c0_i32_0 : i32, i32
  }
  func.func @transform_2(%arg0: i32, %arg1: i32, %arg2: i32) -> (i32, i32) {
    %c0_i32 = arith.constant 0 : i32
    %c0_i32_0 = arith.constant 0 : i32
    %c0_i32_1 = arith.constant 0 : i32
    return %c0_i32, %c0_i32_0 : i32, i32
  }
  func.func @transform_3(%arg0: i32, %arg1: i32, %arg2: i32) -> (i32, i32) {
    %c0_i32 = arith.constant 0 : i32
    %c0_i32_0 = arith.constant 0 : i32
    %c0_i32_1 = arith.constant 0 : i32
    return %c0_i32, %c0_i32_0 : i32, i32
  }
  func.func @transform_4(%arg0: i32, %arg1: i32, %arg2: i32) -> (i32, i32) {
    %c0_i32 = arith.constant 0 : i32
    %c0_i32_0 = arith.constant 0 : i32
    %c0_i32_1 = arith.constant 0 : i32
    return %c0_i32, %c0_i32_0 : i32, i32
  }
  func.func @transform_5(%arg0: i32, %arg1: i32, %arg2: i32) -> (i32, i32, i32, i32) {
    %c0_i32 = arith.constant 0 : i32
    %c0_i32_0 = arith.constant 0 : i32
    %c0_i32_1 = arith.constant 0 : i32
    return %arg0, %arg1, %c0_i32, %c0_i32_0 : i32, i32, i32, i32
  }
  func.func @transform_6(%arg0: i32, %arg1: i32, %arg2: i32) -> (i32, i32, i32, i32) {
    %c0_i32 = arith.constant 0 : i32
    %c0_i32_0 = arith.constant 0 : i32
    %c0_i32_1 = arith.constant 0 : i32
    return %arg0, %arg1, %c0_i32, %c0_i32_0 : i32, i32, i32, i32
  }
}

</mosaic_0001>

<bundles_post_ra>
// kernel: geolocalization_forward.1
= control target key start
LH: loop header
LB: loop body
LE: loop exit
PB: predicated region body
PF: predicated region fallthrough
CT: control target
= control target key end

     0   :  { %s2481_s21 = smov 0   ;;  %s2483_s22 = smov 0   ;;  %s3269_s0 = inlined_call_operand.vmem [shape: bf16[2,16,768], index: 0, kind: input, shape index: {}]   ;;  %s3270_s1 = inlined_call_operand.vmem [shape: bf16[768,256], index: 1, kind: input, shape index: {}]   ;;  %s3271_s2 = inlined_call_operand.vmem [shape: f32[1,256], index: 2, kind: input, shape index: {}]   ;;  %s3272_s3 = inlined_call_operand.vmem [shape: bf16[256,128], index: 3, kind: input, shape index: {}]   ;;  %s3273_s4 = inlined_call_operand.vmem [shape: f32[1,128], index: 4, kind: input, shape index: {}]   ;;  %s3274_s5 = inlined_call_operand.vmem [shape: f32[2,1,256,128], index: 5, kind: output, shape index: {0}]   ;;  %s3275_s6 = inlined_call_operand.vmem [shape: f32[2,1,1,128], index: 6, kind: output, shape index: {1}]  }
   0x1   :  { %s2485_s23 = smov 0  }
   0x2 LB: > { %s36_s24 = sadd.s32 1, %s2439_s22  ;;  %p1765_p0 = scmp.ge.s32.totalorder %s2443_s23, 1  ;;  %s2443_s23 = sphi %s2485_s23, %s17_s23   ;;  %s2439_s22 = sphi %s2483_s22, %s3277_s22   ;;  %s2435_s21 = sphi %s2481_s21, %s3276_s21  }
   0x3   : > { %p38_p1 = scmp.ge.s32.totalorder %s36_s24, 2  ;;  %p250_p2 = scmp.lt.s32.totalorder %s2443_s23, 3 }
   0x5   : > { %s3279_s24 = smov (%p38_p1, %s36_s24), 0  ;;  %p251_p3 = pnand %p1765_p0, %p250_p2 }
   0x6   : > { %p298_p4 = scmp.lt.s32.totalorder (!%p251_p3), %s2435_s21, 1 }
   0x7   : > { %254 = sbr.rel (%p251_p3) target bundleno = 948 (0x3b4), region = 40 }
   0xc   : > { %v1851_v0 = vld [vmem:[%s3270_s1 + $0x70] sm:$0xf]  ;;  %v2281_v1 = vld [vmem:[%s3270_s1 + $0x74] sm:$0xf0]  ;;  %v1843_v11 = vld [vmem:[%s3270_s1 + $0x60] sm:$0xf] }
   0xd   : > { %v1915_v2 = vld [vmem:[%s3270_s1 + $0xf0] sm:$0xf]  ;;  %v1852_v3 = vor.u32 %v2281_v1, %v1851_v0  ;;  %v2297_v4 = vld [vmem:[%s3270_s1 + $0xf4] sm:$0xf0]  ;;  %v2279_v13 = vld [vmem:[%s3270_s1 + $0x64] sm:$0xf0] }
   0xe   : > { %v1979_v5 = vld [vmem:[%s3270_s1 + $0x170] sm:$0xf]  ;;  %v2313_v6 = vld [vmem:[%s3270_s1 + $0x174] sm:$0xf0]  ;;  %v1916_v7 = vor.u32 %v2297_v4, %v1915_v2  ;;  %v1907_v14 = vld [vmem:[%s3270_s1 + $0xe0] sm:$0xf]  ;;  %v1844_v16 = vor.u32 %v2279_v13, %v1843_v11 }
   0xf   : > { %v1980_v8 = vor.u32 %v2313_v6, %v1979_v5  ;;  %v2043_v9 = vld [vmem:[%s3270_s1 + $0x1f0] sm:$0xf]  ;;  %v2329_v10 = vld [vmem:[%s3270_s1 + $0x1f4] sm:$0xf0]  ;;  %980 = vmatpush.bf16.msra.mxu0 %v1852_v3  ;;  %v2295_v15 = vld [vmem:[%s3270_s1 + $0xe4] sm:$0xf0] }
  0x10   : > { %v2044_v12 = vor.u32 %v2329_v10, %v2043_v9  ;;  %994 = vmatpush.bf16.msra.mxu1 %v1916_v7  ;;  %v1908_v17 = vor.u32 %v2295_v15, %v1907_v14  ;;  %v1971_v18 = vld [vmem:[%s3270_s1 + $0x160] sm:$0xf]  ;;  %v2311_v19 = vld [vmem:[%s3270_s1 + $0x164] sm:$0xf0]  ;;  %v1835_v23 = vld [vmem:[%s3270_s1 + $0x50] sm:$0xf] }
  0x11   : > { %1008 = vmatpush.bf16.msra.mxu2 %v1980_v8  ;;  %v2035_v20 = vld [vmem:[%s3270_s1 + $0x1e0] sm:$0xf]  ;;  %v1972_v21 = vor.u32 %v2311_v19, %v1971_v18  ;;  %v2327_v22 = vld [vmem:[%s3270_s1 + $0x1e4] sm:$0xf0]  ;;  %v2277_v24 = vld [vmem:[%s3270_s1 + $0x54] sm:$0xf0] }
  0x12   : > { %1022 = vmatpush.bf16.msra.mxu3 %v2044_v12  ;;  %v2036_v25 = vor.u32 %v2327_v22, %v2035_v20  ;;  %v1899_v26 = vld [vmem:[%s3270_s1 + $0xd0] sm:$0xf]  ;;  %v2293_v27 = vld [vmem:[%s3270_s1 + $0xd4] sm:$0xf0]  ;;  %v1836_v29 = vor.u32 %v2277_v24, %v1835_v23  ;;  %v1827_v35 = vld [vmem:[%s3270_s1 + $0x40] sm:$0xf] }
  0x13   : > { %v1963_v28 = vld [vmem:[%s3270_s1 + $0x150] sm:$0xf]  ;;  %981 = vmatpush.bf16.msra.mxu0 %v1844_v16  ;;  %v2309_v30 = vld [vmem:[%s3270_s1 + $0x154] sm:$0xf0]  ;;  %v1900_v33 = vor.u32 %v2293_v27, %v1899_v26  ;;  %v2275_v36 = vld [vmem:[%s3270_s1 + $0x44] sm:$0xf0] }
  0x14   : > { %v2027_v31 = vld [vmem:[%s3270_s1 + $0x1d0] sm:$0xf]  ;;  %v2325_v32 = vld [vmem:[%s3270_s1 + $0x1d4] sm:$0xf0]  ;;  %995 = vmatpush.bf16.msra.mxu1 %v1908_v17  ;;  %v1964_v34 = vor.u32 %v2309_v30, %v1963_v28  ;;  %v1891_v37 = vld [vmem:[%s3270_s1 + $0xc0] sm:$0xf]  ;;  %v1828_v44 = vor.u32 %v2275_v36, %v1827_v35 }
  0x15   : > { %1009 = vmatpush.bf16.msra.mxu2 %v1972_v21  ;;  %v2028_v38 = vor.u32 %v2325_v32, %v2027_v31  ;;  %v2291_v39 = vld [vmem:[%s3270_s1 + $0xc4] sm:$0xf0]  ;;  %v1955_v40 = vld [vmem:[%s3270_s1 + $0x140] sm:$0xf]  ;;  %v1819_v47 = vld [vmem:[%s3270_s1 + $0x30] sm:$0xf] }
  0x16   : > { %1023 = vmatpush.bf16.msra.mxu3 %v2036_v25  ;;  %v2307_v41 = vld [vmem:[%s3270_s1 + $0x144] sm:$0xf0]  ;;  %v2019_v42 = vld [vmem:[%s3270_s1 + $0x1c0] sm:$0xf]  ;;  %v1892_v45 = vor.u32 %v2291_v39, %v1891_v37  ;;  %v2273_v48 = vld [vmem:[%s3270_s1 + $0x34] sm:$0xf0] }
  0x17   : > { %v2323_v43 = vld [vmem:[%s3270_s1 + $0x1c4] sm:$0xf0]  ;;  %982 = vmatpush.bf16.msra.mxu0 %v1836_v29  ;;  %v1956_v46 = vor.u32 %v2307_v41, %v1955_v40  ;;  %v1883_v49 = vld [vmem:[%s3270_s1 + $0xb0] sm:$0xf]  ;;  %v2289_v51 = vld [vmem:[%s3270_s1 + $0xb4] sm:$0xf0]  ;;  %v1820_v56 = vor.u32 %v2273_v48, %v1819_v47 }
  0x18   : > { %996 = vmatpush.bf16.msra.mxu1 %v1900_v33  ;;  %v2020_v50 = vor.u32 %v2323_v43, %v2019_v42  ;;  %v1947_v52 = vld [vmem:[%s3270_s1 + $0x130] sm:$0xf]  ;;  %v2305_v53 = vld [vmem:[%s3270_s1 + $0x134] sm:$0xf0]  ;;  %v1884_v57 = vor.u32 %v2289_v51, %v1883_v49  ;;  %v1811_v59 = vld [vmem:[%s3270_s1 + $0x20] sm:$0xf] }
  0x19   : > { %1010 = vmatpush.bf16.msra.mxu2 %v1964_v34  ;;  %v2011_v54 = vld [vmem:[%s3270_s1 + $0x1b0] sm:$0xf]  ;;  %v2321_v55 = vld [vmem:[%s3270_s1 + $0x1b4] sm:$0xf0]  ;;  %v1948_v58 = vor.u32 %v2305_v53, %v1947_v52  ;;  %v2271_v60 = vld [vmem:[%s3270_s1 + $0x24] sm:$0xf0] }
  0x1a   : > { %1024 = vmatpush.bf16.msra.mxu3 %v2028_v38  ;;  %v1875_v61 = vld [vmem:[%s3270_s1 + $0xa0] sm:$0xf]  ;;  %v2012_v62 = vor.u32 %v2321_v55, %v2011_v54  ;;  %v2287_v63 = vld [vmem:[%s3270_s1 + $0xa4] sm:$0xf0]  ;;  %v1812_v4 = vor.u32 %v2271_v60, %v1811_v59  ;;  %v1803_v7 = vld [vmem:[%s3270_s1 + $0x10] sm:$0xf] }
  0x1b   : > { %983 = vmatpush.bf16.msra.mxu0 %v1828_v44  ;;  %v1939_v0 = vld [vmem:[%s3270_s1 + $0x120] sm:$0xf]  ;;  %v2303_v1 = vld [vmem:[%s3270_s1 + $0x124] sm:$0xf0]  ;;  %v1876_v5 = vor.u32 %v2287_v63, %v1875_v61  ;;  %v2269_v8 = vld [vmem:[%s3270_s1 + $0x14] sm:$0xf0] }
  0x1c   : > { %997 = vmatpush.bf16.msra.mxu1 %v1892_v45  ;;  %v2003_v2 = vld [vmem:[%s3270_s1 + $0x1a0] sm:$0xf]  ;;  %v2319_v3 = vld [vmem:[%s3270_s1 + $0x1a4] sm:$0xf0]  ;;  %v1940_v6 = vor.u32 %v2303_v1, %v1939_v0  ;;  %v1867_v9 = vld [vmem:[%s3270_s1 + $0x90] sm:$0xf]  ;;  %v1804_v16 = vor.u32 %v2269_v8, %v1803_v7 }
  0x1d   : > { %1011 = vmatpush.bf16.msra.mxu2 %v1956_v46  ;;  %v2004_v10 = vor.u32 %v2319_v3, %v2003_v2  ;;  %v2285_v11 = vld [vmem:[%s3270_s1 + $0x94] sm:$0xf0]  ;;  %v1931_v12 = vld [vmem:[%s3270_s1 + $0x110] sm:$0xf]  ;;  %v1795_v17 = vld [vmem:[%s3270_s1] sm:$0xf] }
  0x1e   : > { %1025 = vmatpush.bf16.msra.mxu3 %v2020_v50  ;;  %v2301_v13 = vld [vmem:[%s3270_s1 + $0x114] sm:$0xf0]  ;;  %v1995_v14 = vld [vmem:[%s3270_s1 + $0x190] sm:$0xf]  ;;  %v2267_v18 = vld [vmem:[%s3270_s1 + $0x4] sm:$0xf0]  ;;  %v1868_v19 = vor.u32 %v2285_v11, %v1867_v9 }
  0x1f   : > { %984 = vmatpush.bf16.msra.mxu0 %v1820_v56  ;;  %v2317_v15 = vld [vmem:[%s3270_s1 + $0x194] sm:$0xf0]  ;;  %v1932_v20 = vor.u32 %v2301_v13, %v1931_v12  ;;  %v1859_v21 = vld [vmem:[%s3270_s1 + $0x80] sm:$0xf]  ;;  %v2283_v22 = vld [vmem:[%s3270_s1 + $0x84] sm:$0xf0]  ;;  %v1796_v31 = vor.u32 %v2267_v18, %v1795_v17 }
  0x20   : > { %998 = vmatpush.bf16.msra.mxu1 %v1884_v57  ;;  %v1923_v23 = vld [vmem:[%s3270_s1 + $0x100] sm:$0xf]  ;;  %v1996_v24 = vor.u32 %v2317_v15, %v1995_v14  ;;  %v2299_v25 = vld [vmem:[%s3270_s1 + $0x104] sm:$0xf0]  ;;  %v2107_v28 = vld [vmem:[%s3270_s1 + $0x270] sm:$0xf]  ;;  %v1860_v35 = vor.u32 %v2283_v22, %v1859_v21 }
  0x21   : > { %1012 = vmatpush.bf16.msra.mxu2 %v1948_v58  ;;  %v1987_v26 = vld [vmem:[%s3270_s1 + $0x180] sm:$0xf]  ;;  %v2315_v27 = vld [vmem:[%s3270_s1 + $0x184] sm:$0xf0]  ;;  %v2345_v29 = vld [vmem:[%s3270_s1 + $0x274] sm:$0xf0]  ;;  %v1924_v36 = vor.u32 %v2299_v25, %v1923_v23 }
  0x22   : > { %1026 = vmatpush.bf16.msra.mxu3 %v2012_v62  ;;  %v2171_v30 = vld [vmem:[%s3270_s1 + $0x2f0] sm:$0xf]  ;;  %v2361_v32 = vld [vmem:[%s3270_s1 + $0x2f4] sm:$0xf0]  ;;  %v2280_v33 = vld [vmem:[%s3270_s1 + $0x74] sm:$0xf]  ;;  %v1988_v39 = vor.u32 %v2315_v27, %v1987_v26  ;;  %v2108_v40 = vor.u32 %v2345_v29, %v2107_v28 }
  0x23   : > { %985 = vmatpush.bf16.msra.mxu0 %v1812_v4  ;;  %v1853_v34 = vld [vmem:[%s3270_s1 + $0x78] sm:$0xf0]  ;;  %v2296_v37 = vld [vmem:[%s3270_s1 + $0xf4] sm:$0xf]  ;;  %v2172_v41 = vor.u32 %v2361_v32, %v2171_v30  ;;  %v2099_v43 = vld [vmem:[%s3270_s1 + $0x260] sm:$0xf] }
  0x24   : > { %999 = vmatpush.bf16.msra.mxu1 %v1876_v5  ;;  %v1917_v38 = vld [vmem:[%s3270_s1 + $0xf8] sm:$0xf0]  ;;  %v1856_v42 = vor.u32 %v2280_v33, %v1853_v34  ;;  %v2343_v44 = vld [vmem:[%s3270_s1 + $0x264] sm:$0xf0]  ;;  %v2163_v45 = vld [vmem:[%s3270_s1 + $0x2e0] sm:$0xf] }
  0x25   : > { %1013 = vmatpush.bf16.msra.mxu2 %v1940_v6  ;;  %v1920_v46 = vor.u32 %v2296_v37, %v1917_v38  ;;  %v2359_v47 = vld [vmem:[%s3270_s1 + $0x2e4] sm:$0xf0]  ;;  %v2278_v48 = vld [vmem:[%s3270_s1 + $0x64] sm:$0xf]  ;;  %v1845_v49 = vld [vmem:[%s3270_s1 + $0x68] sm:$0xf0]  ;;  %v2100_v52 = vor.u32 %v2343_v44, %v2099_v43 }
  0x26   : > { %1027 = vmatpush.bf16.msra.mxu3 %v2004_v10  ;;  %v2294_v50 = vld [vmem:[%s3270_s1 + $0xe4] sm:$0xf]  ;;  %v1909_v51 = vld [vmem:[%s3270_s1 + $0xe8] sm:$0xf0]  ;;  %v2091_v53 = vld [vmem:[%s3270_s1 + $0x250] sm:$0xf]  ;;  %v2164_v56 = vor.u32 %v2359_v47, %v2163_v45  ;;  %v1848_v57 = vor.u32 %v2278_v48, %v1845_v49 }
  0x27   : > { %986 = vmatpush.bf16.msra.mxu0 %v1804_v16  ;;  %v2341_v54 = vld [vmem:[%s3270_s1 + $0x254] sm:$0xf0]  ;;  %v2155_v55 = vld [vmem:[%s3270_s1 + $0x2d0] sm:$0xf]  ;;  %v2276_v59 = vld [vmem:[%s3270_s1 + $0x54] sm:$0xf]  ;;  %v1912_v60 = vor.u32 %v2294_v50, %v1909_v51 }
  0x28   : > { %1000 = vmatpush.bf16.msra.mxu1 %v1868_v19  ;;  %v2357_v58 = vld [vmem:[%s3270_s1 + $0x2d4] sm:$0xf0]  ;;  %s3281_s21 = smov (!%p298_p4, %s2435_s21), 1  ;;  %v1837_v61 = vld [vmem:[%s3270_s1 + $0x58] sm:$0xf0]  ;;  %v2092_v2 = vor.u32 %v2341_v54, %v2091_v53  ;;  %vm1419_vm6 = vcmask 130048  }
  0x29   : > { %1014 = vmatpush.bf16.msra.mxu2 %v1932_v20  ;;  %v2292_v62 = vld [vmem:[%s3270_s1 + $0xd4] sm:$0xf]  ;;  %v1901_v63 = vld [vmem:[%s3270_s1 + $0xd8] sm:$0xf0]  ;;  %v2083_v0 = vld [vmem:[%s3270_s1 + $0x240] sm:$0xf]  ;;  %v2156_v6 = vor.u32 %v2357_v58, %v2155_v55  ;;  %v1840_v7 = vor.u32 %v2276_v59, %v1837_v61  ;;  %s3201_s10 = scalar_lea.vmem %s3275_s6, %s3281_s21 }
  0x2a   : > { %1028 = vmatpush.bf16.msra.mxu3 %v1996_v24  ;;  %v2339_v1 = vld [vmem:[%s3270_s1 + $0x244] sm:$0xf0]  ;;  %s2381_s25 = smul.u32 48, %s3281_s21  ;;  %v2147_v3 = vld [vmem:[%s3270_s1 + $0x2c0] sm:$0xf]  ;;  %v1904_v11 = vor.u32 %v2292_v62, %v1901_v63  ;;  %s2259_s11 = sshll.u32 %s3281_s21, 8 }
  0x2b   : > { %987 = vmatpush.bf16.msra.mxu0 %v1796_v31  ;;  %v2355_v4 = vld [vmem:[%s3270_s1 + $0x2c4] sm:$0xf0]  ;;  %v2274_v5 = vld [vmem:[%s3270_s1 + $0x44] sm:$0xf]  ;;  %v1829_v8 = vld [vmem:[%s3270_s1 + $0x48] sm:$0xf0]  ;;  %v2084_v19 = vor.u32 %v2339_v1, %v2083_v0  ;;  %s3226_s14 = scalar_lea.vmem %s3274_s5, %s2259_s11 }
  0x2c   : > { %1001 = vmatpush.bf16.msra.mxu1 %v1860_v35  ;;  %v2290_v9 = vld [vmem:[%s3270_s1 + $0xc4] sm:$0xf]  ;;  %v1893_v10 = vld [vmem:[%s3270_s1 + $0xc8] sm:$0xf0]  ;;  %s2797_s16 = scalar_lea.vmem %s3269_s0, %s2381_s25  ;;  %v2148_v24 = vor.u32 %v2355_v4, %v2147_v3  ;;  %v1832_v25 = vor.u32 %v2274_v5, %v1829_v8  ;;  %v2075_v26 = vld [vmem:[%s3270_s1 + $0x230] sm:$0xf] }
  0x2d   : > { %1015 = vmatpush.bf16.msra.mxu2 %v1924_v36  ;;  %v1771_v12 = vld [vmem:[%s2797_s16] sm:$0xf]  ;;  %v2263_v13 = vld [vmem:[%s2797_s16 + $0x14] sm:$0xf0]  ;;  %v2260_v14 = vld [vmem:[%s2797_s16 + $0x4] sm:$0xf]  ;;  %v1896_v30 = vor.u32 %v2290_v9, %v1893_v10 }
  0x2e   : > { %1029 = vmatpush.bf16.msra.mxu3 %v1988_v39  ;;  %v2802_v15 = vor.u32 %v2263_v13, %v1771_v12  ;;  %v1773_v16 = vld [vmem:[%s2797_s16 + $0x18] sm:$0xf0]  ;;  %v1779_v17 = vld [vmem:[%s2797_s16 + $0x8] sm:$0xf]  ;;  %v2264_v18 = vld [vmem:[%s2797_s16 + $0x1c] sm:$0xf0] }
  0x2f   : > { %1036 = vmatpush.bf16.msrb.mxu0 %v2108_v40  ;;  %v2807_v20 = vor.u32 %v2260_v14, %v1773_v16  ;;  %v2809_v21 = vor.u32 %v2264_v18, %v1779_v17  ;;  %v2261_v22 = vld [vmem:[%s2797_s16 + $0xc] sm:$0xf]  ;;  %v1781_v23 = vld [vmem:[%s2797_s16 + $0x20] sm:$0xf0]  ;;  %v2337_v27 = vld [vmem:[%s3270_s1 + $0x234] sm:$0xf0] }
  0x30   : > { %1050 = vmatpush.bf16.msrb.mxu1 %v2172_v41  ;;  %v2139_v28 = vld [vmem:[%s3270_s1 + $0x2b0] sm:$0xf]  ;;  %v2822_v29 = vor.u32 %v2261_v22, %v1781_v23  ;;  %988 = vmatmul.bf16.vlgmr.msra.gmra.mxu0 %v2802_v15  ;;  %v2353_v31 = vld [vmem:[%s3270_s1 + $0x2b4] sm:$0xf0]  ;;  %v2272_v32 = vld [vmem:[%s3270_s1 + $0x34] sm:$0xf]  ;;  %v2076_v36 = vor.u32 %v2337_v27, %v2075_v26 }
  0x31   : > { %1064 = vmatpush.bf16.msrb.mxu2 %v1856_v42  ;;  %v1821_v33 = vld [vmem:[%s3270_s1 + $0x38] sm:$0xf0]  ;;  %v2288_v34 = vld [vmem:[%s3270_s1 + $0xb4] sm:$0xf]  ;;  %1002 = vmatmul.bf16.vlgmr.msra.gmra.mxu1 %v2807_v20  ;;  %v2140_v37 = vor.u32 %v2353_v31, %v2139_v28  ;;  %v2067_v39 = vld [vmem:[%s3270_s1 + $0x220] sm:$0xf] }
  0x32   : > { %1078 = vmatpush.bf16.msrb.mxu3 %v1920_v46  ;;  %v1885_v35 = vld [vmem:[%s3270_s1 + $0xb8] sm:$0xf0]  ;;  %1016 = vmatmul.bf16.vlgmr.msra.gmra.mxu2 %v2809_v21  ;;  %v1824_v38 = vor.u32 %v2272_v32, %v1821_v33  ;;  %v2335_v40 = vld [vmem:[%s3270_s1 + $0x224] sm:$0xf0]  ;;  %v2131_v41 = vld [vmem:[%s3270_s1 + $0x2a0] sm:$0xf] }
  0x33   : > { %1037 = vmatpush.bf16.msrb.mxu0 %v2100_v52  ;;  %1030 = vmatmul.bf16.vlgmr.msra.gmra.mxu3 %v2822_v29  ;;  %v1888_v42 = vor.u32 %v2288_v34, %v1885_v35  ;;  %v2351_v43 = vld [vmem:[%s3270_s1 + $0x2a4] sm:$0xf0]  ;;  %v2270_v44 = vld [vmem:[%s3270_s1 + $0x24] sm:$0xf]  ;;  %v1813_v45 = vld [vmem:[%s3270_s1 + $0x28] sm:$0xf0]  ;;  %v2068_v48 = vor.u32 %v2335_v40, %v2067_v39 }
  0x34   : > { %1051 = vmatpush.bf16.msrb.mxu1 %v2164_v56  ;;  %v2286_v46 = vld [vmem:[%s3270_s1 + $0xa4] sm:$0xf]  ;;  %v1877_v47 = vld [vmem:[%s3270_s1 + $0xa8] sm:$0xf0]  ;;  %v2132_v49 = vor.u32 %v2351_v43, %v2131_v41  ;;  %v1816_v50 = vor.u32 %v2270_v44, %v1813_v45  ;;  %v2059_v51 = vld [vmem:[%s3270_s1 + $0x210] sm:$0xf] }
  0x35   : > { %1065 = vmatpush.bf16.msrb.mxu2 %v1848_v57  ;;  %v2333_v52 = vld [vmem:[%s3270_s1 + $0x214] sm:$0xf0]  ;;  %v2123_v53 = vld [vmem:[%s3270_s1 + $0x290] sm:$0xf]  ;;  %v1880_v54 = vor.u32 %v2286_v46, %v1877_v47  ;;  %v2268_v56 = vld [vmem:[%s3270_s1 + $0x14] sm:$0xf] }
  0x36   : > { %1079 = vmatpush.bf16.msrb.mxu3 %v1912_v60  ;;  %v2349_v55 = vld [vmem:[%s3270_s1 + $0x294] sm:$0xf0]  ;;  %v1805_v57 = vld [vmem:[%s3270_s1 + $0x18] sm:$0xf0]  ;;  %v2284_v58 = vld [vmem:[%s3270_s1 + $0x94] sm:$0xf]  ;;  %v2060_v60 = vor.u32 %v2333_v52, %v2059_v51 }
  0x37   : > { %1038 = vmatpush.bf16.msrb.mxu0 %v2092_v2  ;;  %v1869_v59 = vld [vmem:[%s3270_s1 + $0x98] sm:$0xf0]  ;;  %v2051_v61 = vld [vmem:[%s3270_s1 + $0x200] sm:$0xf]  ;;  %v2331_v62 = vld [vmem:[%s3270_s1 + $0x204] sm:$0xf0]  ;;  %v2124_v0 = vor.u32 %v2349_v55, %v2123_v53  ;;  %v1808_v1 = vor.u32 %v2268_v56, %v1805_v57 }
  0x38   : > { %1052 = vmatpush.bf16.msrb.mxu1 %v2156_v6  ;;  %v2115_v63 = vld [vmem:[%s3270_s1 + $0x280] sm:$0xf]  ;;  %v2347_v2 = vld [vmem:[%s3270_s1 + $0x284] sm:$0xf0]  ;;  %v2266_v3 = vld [vmem:[%s3270_s1 + $0x4] sm:$0xf]  ;;  %v1872_v5 = vor.u32 %v2284_v58, %v1869_v59  ;;  %v2052_v12 = vor.u32 %v2331_v62, %v2051_v61 }
  0x39   : > { %1066 = vmatpush.bf16.msrb.mxu2 %v1840_v7  ;;  %v1797_v4 = vld [vmem:[%s3270_s1 + $0x8] sm:$0xf0]  ;;  %v2282_v6 = vld [vmem:[%s3270_s1 + $0x84] sm:$0xf]  ;;  %v2312_v8 = vld [vmem:[%s3270_s1 + $0x174] sm:$0xf]  ;;  %v2116_v17 = vor.u32 %v2347_v2, %v2115_v63 }
  0x3a   : > { %1080 = vmatpush.bf16.msrb.mxu3 %v1904_v11  ;;  %v1861_v7 = vld [vmem:[%s3270_s1 + $0x88] sm:$0xf0]  ;;  %v1981_v9 = vld [vmem:[%s3270_s1 + $0x178] sm:$0xf0]  ;;  %v2328_v10 = vld [vmem:[%s3270_s1 + $0x1f4] sm:$0xf]  ;;  %v1800_v18 = vor.u32 %v2266_v3, %v1797_v4 }
  0x3b   : > { %1039 = vmatpush.bf16.msrb.mxu0 %v2084_v19  ;;  %v2045_v11 = vld [vmem:[%s3270_s1 + $0x1f8] sm:$0xf0]  ;;  %v2344_v13 = vld [vmem:[%s3270_s1 + $0x274] sm:$0xf]  ;;  %v1787_v22 = vld [vmem:[%s2797_s16 + $0x10] sm:$0xf] }
  0x3c   : > { %1053 = vmatpush.bf16.msrb.mxu1 %v2148_v24  ;;  %v2109_v14 = vld [vmem:[%s3270_s1 + $0x278] sm:$0xf0]  ;;  %v2360_v16 = vld [vmem:[%s3270_s1 + $0x2f4] sm:$0xf]  ;;  %v2265_v23 = vld [vmem:[%s2797_s16 + $0x24] sm:$0xf0]  ;;  %v1864_v24 = vor.u32 %v2282_v6, %v1861_v7  ;;  %v2048_v28 = vor.u32 %v2328_v10, %v2045_v11 }
  0x3d   : > { %1067 = vmatpush.bf16.msrb.mxu2 %v1832_v25  ;;  %v2173_v19 = vld [vmem:[%s3270_s1 + $0x2f8] sm:$0xf0]  ;;  %v1984_v25 = vor.u32 %v2312_v8, %v1981_v9  ;;  %v2262_v26 = vld [vmem:[%s2797_s16 + $0x14] sm:$0xf]  ;;  %v1789_v27 = vld [vmem:[%s2797_s16 + $0x28] sm:$0xf0]  ;;  %v2952_v35 = vor.u32 %v2265_v23, %v1787_v22 }
  0x3e   : > { %1081 = vmatpush.bf16.msrb.mxu3 %v1896_v30  ;;  %v2112_v30 = vor.u32 %v2344_v13, %v2109_v14  ;;  %v2310_v31 = vld [vmem:[%s3270_s1 + $0x164] sm:$0xf]  ;;  %v1973_v32 = vld [vmem:[%s3270_s1 + $0x168] sm:$0xf0]  ;;  %v2176_v34 = vor.u32 %v2360_v16, %v2173_v19  ;;  %v2963_v39 = vor.u32 %v2262_v26, %v1789_v27  ;;  %v2308_v45 = vld [vmem:[%s3270_s1 + $0x154] sm:$0xf] }
  0x3f   : > { %1040 = vmatpush.bf16.msrb.mxu0 %v2076_v36  ;;  %v2326_v33 = vld [vmem:[%s3270_s1 + $0x1e4] sm:$0xf]  ;;  %v2037_v36 = vld [vmem:[%s3270_s1 + $0x1e8] sm:$0xf0]  ;;  %v1965_v46 = vld [vmem:[%s3270_s1 + $0x158] sm:$0xf0] }
  0x40   : > { %1054 = vmatpush.bf16.msrb.mxu1 %v2140_v37  ;;  %v2342_v37 = vld [vmem:[%s3270_s1 + $0x264] sm:$0xf]  ;;  %v2165_v41 = vld [vmem:[%s3270_s1 + $0x2e8] sm:$0xf0]  ;;  %v2040_v43 = vor.u32 %v2326_v33, %v2037_v36  ;;  %v2324_v47 = vld [vmem:[%s3270_s1 + $0x1d4] sm:$0xf] }
  0x41   : > { %1068 = vmatpush.bf16.msrb.mxu2 %v1824_v38  ;;  %v2101_v38 = vld [vmem:[%s3270_s1 + $0x268] sm:$0xf0]  ;;  %v2358_v40 = vld [vmem:[%s3270_s1 + $0x2e4] sm:$0xf]  ;;  %v2093_v51 = vld [vmem:[%s3270_s1 + $0x258] sm:$0xf0] }
  0x42   : > { %1082 = vmatpush.bf16.msrb.mxu3 %v1888_v42  ;;  %v1976_v42 = vor.u32 %v2310_v31, %v1973_v32  ;;  %v2104_v44 = vor.u32 %v2342_v37, %v2101_v38  ;;  %v2356_v52 = vld [vmem:[%s3270_s1 + $0x2d4] sm:$0xf]  ;;  %v2157_v53 = vld [vmem:[%s3270_s1 + $0x2d8] sm:$0xf0]  ;;  %v2306_v55 = vld [vmem:[%s3270_s1 + $0x144] sm:$0xf] }
  0x43   : > { %1041 = vmatpush.bf16.msrb.mxu0 %v2068_v48  ;;  %v2168_v48 = vor.u32 %v2358_v40, %v2165_v41  ;;  %v1957_v57 = vld [vmem:[%s3270_s1 + $0x148] sm:$0xf0]  ;;  %v2322_v58 = vld [vmem:[%s3270_s1 + $0x1c4] sm:$0xf]  ;;  %v2160_v59 = vor.u32 %v2356_v52, %v2157_v53  ;;  %v2304_v3 = vld [vmem:[%s3270_s1 + $0x134] sm:$0xf] }
  0x44   : > { %1055 = vmatpush.bf16.msrb.mxu1 %v2132_v49  ;;  %v2029_v49 = vld [vmem:[%s3270_s1 + $0x1d8] sm:$0xf0]  ;;  %v2085_v61 = vld [vmem:[%s3270_s1 + $0x248] sm:$0xf0]  ;;  %v2354_v62 = vld [vmem:[%s3270_s1 + $0x2c4] sm:$0xf] }
  0x45   : > { %1069 = vmatpush.bf16.msrb.mxu2 %v1816_v50  ;;  %v2340_v50 = vld [vmem:[%s3270_s1 + $0x254] sm:$0xf]  ;;  %v2032_v56 = vor.u32 %v2324_v47, %v2029_v49  ;;  %v2149_v63 = vld [vmem:[%s3270_s1 + $0x2c8] sm:$0xf0]  ;;  %v1949_v4 = vld [vmem:[%s3270_s1 + $0x138] sm:$0xf0] }
  0x46   : > { %1083 = vmatpush.bf16.msrb.mxu3 %v1880_v54  ;;  %v1968_v54 = vor.u32 %v2308_v45, %v1965_v46  ;;  %v2152_v6 = vor.u32 %v2354_v62, %v2149_v63  ;;  %v2013_v7 = vld [vmem:[%s3270_s1 + $0x1b8] sm:$0xf0]  ;;  %v2336_v8 = vld [vmem:[%s3270_s1 + $0x234] sm:$0xf]  ;;  %v2302_v16 = vld [vmem:[%s3270_s1 + $0x124] sm:$0xf] }
  0x47   : > { %1042 = vmatpush.bf16.msrb.mxu0 %v2060_v60  ;;  %v2338_v60 = vld [vmem:[%s3270_s1 + $0x244] sm:$0xf]  ;;  %v2077_v9 = vld [vmem:[%s3270_s1 + $0x238] sm:$0xf0]  ;;  %v2352_v10 = vld [vmem:[%s3270_s1 + $0x2b4] sm:$0xf] }
  0x48   : > { %1056 = vmatpush.bf16.msrb.mxu1 %v2124_v0  ;;  %v1960_v0 = vor.u32 %v2306_v55, %v1957_v57  ;;  %v2088_v2 = vor.u32 %v2338_v60, %v2085_v61  ;;  %v2141_v11 = vld [vmem:[%s3270_s1 + $0x2b8] sm:$0xf0]  ;;  %v2080_v14 = vor.u32 %v2336_v8, %v2077_v9  ;;  %v2005_v22 = vld [vmem:[%s3270_s1 + $0x1a8] sm:$0xf0]  ;;  %v2334_v23 = vld [vmem:[%s3270_s1 + $0x224] sm:$0xf] }
  0x49   : > { %1070 = vmatpush.bf16.msrb.mxu2 %v1808_v1  ;;  %v2144_v19 = vor.u32 %v2352_v10, %v2141_v11  ;;  %v2133_v26 = vld [vmem:[%s3270_s1 + $0x2a8] sm:$0xf0]  ;;  %v2300_v31 = vld [vmem:[%s3270_s1 + $0x114] sm:$0xf]  ;;  %v1933_v32 = vld [vmem:[%s3270_s1 + $0x118] sm:$0xf0] }
  0x4a   : > { %1084 = vmatpush.bf16.msrb.mxu3 %v1872_v5  ;;  %v2320_v5 = vld [vmem:[%s3270_s1 + $0x1b4] sm:$0xf]  ;;  %v1997_v36 = vld [vmem:[%s3270_s1 + $0x198] sm:$0xf0]  ;;  %v2298_v45 = vld [vmem:[%s3270_s1 + $0x104] sm:$0xf] }
  0x4b   : > { %1043 = vmatpush.bf16.msrb.mxu0 %v2052_v12  ;;  %v1952_v12 = vor.u32 %v2304_v3, %v1949_v4  ;;  %v2016_v13 = vor.u32 %v2320_v5, %v2013_v7  ;;  %v2316_v33 = vld [vmem:[%s3270_s1 + $0x194] sm:$0xf]  ;;  %v2061_v38 = vld [vmem:[%s3270_s1 + $0x218] sm:$0xf0]  ;;  %v1925_v46 = vld [vmem:[%s3270_s1 + $0x108] sm:$0xf0] }
  0x4c   : > { %1057 = vmatpush.bf16.msrb.mxu1 %v2116_v17  ;;  %v1941_v17 = vld [vmem:[%s3270_s1 + $0x128] sm:$0xf0]  ;;  %v2332_v37 = vld [vmem:[%s3270_s1 + $0x214] sm:$0xf]  ;;  %v2125_v41 = vld [vmem:[%s3270_s1 + $0x298] sm:$0xf0] }
  0x4d   : > { %1071 = vmatpush.bf16.msrb.mxu2 %v1800_v18  ;;  %v2318_v18 = vld [vmem:[%s3270_s1 + $0x1a4] sm:$0xf]  ;;  %v1944_v27 = vor.u32 %v2302_v16, %v1941_v17  ;;  %v2348_v40 = vld [vmem:[%s3270_s1 + $0x294] sm:$0xf]  ;;  %v1989_v49 = vld [vmem:[%s3270_s1 + $0x188] sm:$0xf0] }
  0x4e   : > { %1085 = vmatpush.bf16.msrb.mxu3 %v1864_v24  ;;  %1044 = vmatmul.bf16.vlgmr.msrb.gmra.mxu0 %v2952_v35  ;;  %v2069_v24 = vld [vmem:[%s3270_s1 + $0x228] sm:$0xf0]  ;;  %v2314_v47 = vld [vmem:[%s3270_s1 + $0x184] sm:$0xf]  ;;  %v464_v62 = vld [vmem:[%s3271_s2] sm:$0x3] }
  0x4f   : > { %1092 = vmatpush.bf16.msra.mxu0 %v1984_v25  ;;  %1058 = vmatmul.bf16.vlgmr.msrb.gmra.mxu1 %v2963_v39  ;;  %v2350_v25 = vld [vmem:[%s3270_s1 + $0x2a4] sm:$0xf]  ;;  %v2117_v53 = vld [vmem:[%s3270_s1 + $0x288] sm:$0xf0]  ;;  %v1992_v55 = vor.u32 %v2314_v47, %v1989_v49  ;;  %v467_v5 = vperm.slane %v464_v62, 1 }
  0x50   : > { %1106 = vmatpush.bf16.msra.mxu1 %v2048_v28  ;;  %1072 = vmatmul.bf16.vlgmr.msrb.gmra.mxu2 %v2802_v15  ;;  %v2096_v15 = vor.u32 %v2340_v50, %v2093_v51  ;;  %v2008_v28 = vor.u32 %v2318_v18, %v2005_v22  ;;  %v2330_v50 = vld [vmem:[%s3270_s1 + $0x204] sm:$0xf]  ;;  %v2053_v51 = vld [vmem:[%s3270_s1 + $0x208] sm:$0xf0] }
  0x51   : > { %1120 = vmatpush.bf16.msra.mxu2 %v2112_v30  ;;  %1086 = vmatmul.bf16.vlgmr.msrb.gmra.mxu3 %v2807_v20  ;;  %v2021_v20 = vld [vmem:[%s3270_s1 + $0x1c8] sm:$0xf0]  ;;  %v2072_v30 = vor.u32 %v2334_v23, %v2069_v24  ;;  %v2346_v52 = vld [vmem:[%s3270_s1 + $0x284] sm:$0xf] }
  0x52   : > { %1134 = vmatpush.bf16.msra.mxu3 %v2176_v34  ;;  %v2024_v1 = vor.u32 %v2322_v58, %v2021_v20  ;;  %v2136_v34 = vor.u32 %v2350_v25, %v2133_v26 }
  0x53   : > { %1093 = vmatpush.bf16.msra.mxu0 %v1976_v42  ;;  %v1936_v42 = vor.u32 %v2300_v31, %v1933_v32 }
  0x54   : > { %1107 = vmatpush.bf16.msra.mxu1 %v2040_v43  ;;  %v2000_v43 = vor.u32 %v2316_v33, %v1997_v36 }
  0x55   : > { %1121 = vmatpush.bf16.msra.mxu2 %v2104_v44  ;;  %v2064_v44 = vor.u32 %v2332_v37, %v2061_v38 }
  0x56   : > { %1135 = vmatpush.bf16.msra.mxu3 %v2168_v48  ;;  %v2128_v48 = vor.u32 %v2348_v40, %v2125_v41 }
  0x57   : > { %1094 = vmatpush.bf16.msra.mxu0 %v1968_v54  ;;  %v1928_v54 = vor.u32 %v2298_v45, %v1925_v46 }
  0x58   : > { %1108 = vmatpush.bf16.msra.mxu1 %v2032_v56  ;;  %v2056_v56 = vor.u32 %v2330_v50, %v2053_v51 }
  0x59   : > { %1122 = vmatpush.bf16.msra.mxu2 %v2096_v15  ;;  %v2120_v15 = vor.u32 %v2346_v52, %v2117_v53 }
  0x5a   : > { %1136 = vmatpush.bf16.msra.mxu3 %v2160_v59 }
  0x5b   : > { %1095 = vmatpush.bf16.msra.mxu0 %v1960_v0 }
  0x5c   : > { %1109 = vmatpush.bf16.msra.mxu1 %v2024_v1  ;;  %v466_v1 = vperm.slane %v464_v62, 0  ;;  %v2373_v62 = vld [vmem:[%s3272_s3 + $0x58] sm:$0xff] }
  0x5d   : > { %1123 = vmatpush.bf16.msra.mxu2 %v2088_v2 }
  0x5e   : > { %1137 = vmatpush.bf16.msra.mxu3 %v2152_v6 }
  0x5f   : > { %1096 = vmatpush.bf16.msra.mxu0 %v1952_v12 }
  0x60   : > { %1110 = vmatpush.bf16.msra.mxu1 %v2016_v13 }
  0x61   : > { %1124 = vmatpush.bf16.msra.mxu2 %v2080_v14 }
  0x62   : > { %1138 = vmatpush.bf16.msra.mxu3 %v2144_v19 }
  0x63   : > { %1097 = vmatpush.bf16.msra.mxu0 %v1944_v27 }
  0x64   : > { %1111 = vmatpush.bf16.msra.mxu1 %v2008_v28 }
  0x65   : > { %1125 = vmatpush.bf16.msra.mxu2 %v2072_v30 }
  0x66   : > { %1139 = vmatpush.bf16.msra.mxu3 %v2136_v34 }
  0x67   : > { %1098 = vmatpush.bf16.msra.mxu0 %v1936_v42 }
  0x68   : > { %1112 = vmatpush.bf16.msra.mxu1 %v2000_v43 }
  0x69   : > { %1126 = vmatpush.bf16.msra.mxu2 %v2064_v44 }
  0x6a   : > { %1140 = vmatpush.bf16.msra.mxu3 %v2128_v48 }
  0x6b   : > { %1099 = vmatpush.bf16.msra.mxu0 %v1928_v54 }
  0x6c   : > { %1113 = vmatpush.bf16.msra.mxu1 %v1992_v55  ;;  %v2369_v55 = vld [vmem:[%s3272_s3 + $0x38] sm:$0xff] }
  0x6d   : > { %1127 = vmatpush.bf16.msra.mxu2 %v2056_v56  ;;  %v2377_v56 = vld [vmem:[%s3272_s3 + $0x78] sm:$0xff] }
  0x6e   : > { %1141 = vmatpush.bf16.msra.mxu3 %v2120_v15  ;;  %1100 = vmatmul.bf16.vlgmr.msra.gmra.mxu0 %v2809_v21  ;;  %v2368_v15 = vld [vmem:[%s3272_s3 + $0x30] sm:$0xff] }
  0x6f   : > { %1114 = vmatmul.bf16.vlgmr.msra.gmra.mxu1 %v2822_v29  ;;  %1322 = vmatpush.bf16.msrb.mxu0 %v2369_v55 }
  0x70   : > { %1128 = vmatmul.bf16.vlgmr.msra.gmra.mxu2 %v2952_v35  ;;  %1336 = vmatpush.bf16.msrb.mxu1 %v2377_v56 }
  0x71   : > { %1142 = vmatmul.bf16.vlgmr.msra.gmra.mxu3 %v2963_v39 }
  0x73   : > { %1323 = vmatpush.bf16.msrb.mxu0 %v2368_v15 }
  0xad   : > { %v989_v57 = vpop.f32.mrf.mxu0 }
  0xae   : > { %v1003_v58 = vpop.f32.mrf.mxu1  ;;  %v990_v29 = vadd.f32 %v989_v57, %v466_v1  ;;  %v2376_v57 = vld [vmem:[%s3272_s3 + $0x70] sm:$0xff] }
  0xaf   : > { %1337 = vmatpush.bf16.msrb.mxu1 %v2376_v57 }
  0xb0   : > { %v1004_v35 = vadd.f32 %v1003_v58, %v990_v29  ;;  %v2367_v58 = vld [vmem:[%s3272_s3 + $0x28] sm:$0xff]  ;;  %v2370_v29 = vld [vmem:[%s3272_s3 + $0x40] sm:$0xff] }
  0xb1   : > { %1324 = vmatpush.bf16.msrb.mxu0 %v2367_v58 }
  0xb5   : > { %v1017_v20 = vpop.f32.mrf.mxu2  ;;  %v991_v60 = vpop.f32.mrf.mxu0 }
  0xb6   : > { %v1031_v59 = vpop.f32.mrf.mxu3  ;;  %v1005_v61 = vpop.f32.mrf.mxu1  ;;  %v992_v6 = vadd.f32 %v991_v60, %v466_v1  ;;  %v1018_v7 = vadd.f32 %v1017_v20, %v1004_v35  ;;  %v2375_v20 = vld [vmem:[%s3272_s3 + $0x68] sm:$0xff]  ;;  %v2374_v60 = vld [vmem:[%s3272_s3 + $0x60] sm:$0xff] }
  0xb7   : > { %1338 = vmatpush.bf16.msrb.mxu1 %v2375_v20  ;;  %v2363_v1 = vld [vmem:[%s3272_s3 + $0x8] sm:$0xff] }
  0xb8   : > { %v1006_v10 = vadd.f32 %v1005_v61, %v992_v6  ;;  %v1032_v11 = vadd.f32 %v1031_v59, %v1018_v7  ;;  %v2366_v59 = vld [vmem:[%s3272_s3 + $0x20] sm:$0xff]  ;;  %v2365_v61 = vld [vmem:[%s3272_s3 + $0x18] sm:$0xff] }
  0xb9   : > { %1325 = vmatpush.bf16.msrb.mxu0 %v2366_v59 }
  0xbb   : > { %1339 = vmatpush.bf16.msrb.mxu1 %v2374_v60 }
  0xbd   : > { %v1019_v63 = vpop.f32.mrf.mxu2  ;;  %1326 = vmatpush.bf16.msrb.mxu0 %v2365_v61 }
  0xbe   : > { %v1033_v0 = vpop.f32.mrf.mxu3  ;;  %v1020_v18 = vadd.f32 %v1019_v63, %v1006_v10  ;;  %v2364_v63 = vld [vmem:[%s3272_s3 + $0x10] sm:$0xff] }
  0xbf   : > { %1340 = vmatpush.bf16.msrb.mxu1 %v2373_v62 }
  0xc0   : > { %v1034_v25 = vadd.f32 %v1033_v0, %v1020_v18  ;;  %v2372_v0 = vld [vmem:[%s3272_s3 + $0x50] sm:$0xff] }
  0xc1   : > { %1327 = vmatpush.bf16.msrb.mxu0 %v2364_v63 }
  0xc3   : > { %1341 = vmatpush.bf16.msrb.mxu1 %v2372_v0 }
  0xc5   : > { %1328 = vmatpush.bf16.msrb.mxu0 %v2363_v1 }
  0xcb   : > { %v1045_v21 = vpop.f32.mrf.mxu0 }
  0xcc   : > { %v1059_v2 = vpop.f32.mrf.mxu1  ;;  %v1046_v17 = vadd.f32 %v1045_v21, %v1032_v11  ;;  %v2371_v21 = vld [vmem:[%s3272_s3 + $0x48] sm:$0xff] }
  0xcd   : > { %1342 = vmatpush.bf16.msrb.mxu1 %v2371_v21 }
  0xce   : > { %v1060_v24 = vadd.f32 %v1059_v2, %v1046_v17  ;;  %v2362_v2 = vld [vmem:[%s3272_s3] sm:$0xff] }
  0xcf   : > { %1329 = vmatpush.bf16.msrb.mxu0 %v2362_v2 }
  0xd0   : > { %v3126_v33 = vmax.f32 %v1060_v24, 0.0 }
  0xd1   : > { %1343 = vmatpush.bf16.msrb.mxu1 %v2370_v29 }
  0xd2   : > { %v1152_v43 = vmul.f32 %v3126_v33, %v3126_v33 }
  0xd3   : > { %v1073_v3 = vpop.f32.mrf.mxu2  ;;  %v1047_v39 = vpop.f32.mrf.mxu0 }
  0xd4   : > { %v1087_v4 = vpop.f32.mrf.mxu3  ;;  %v1061_v8 = vpop.f32.mrf.mxu1  ;;  %v1074_v9 = vadd.f32 %v1073_v3, %v467_v5  ;;  %v1048_v34 = vadd.f32 %v1047_v39, %v1034_v25 }
  0xd6   : > { %v1088_v13 = vadd.f32 %v1087_v4, %v1074_v9  ;;  %v1062_v41 = vadd.f32 %v1061_v8, %v1048_v34 }
  0xd8   : > { %v3134_v49 = vmax.f32 %v1062_v41, 0.0 }
  0xda   : > { %v1154_v52 = vmul.f32 %v3134_v49, %v3134_v49 }
  0xdb   : > { %v1075_v12 = vpop.f32.mrf.mxu2 }
  0xdc   : > { %v1089_v14 = vpop.f32.mrf.mxu3  ;;  %v1076_v23 = vadd.f32 %v1075_v12, %v467_v5 }
  0xde   : > { %v1090_v28 = vadd.f32 %v1089_v14, %v1076_v23 }
  0xeb   : > { %v1101_v16 = vpop.f32.mrf.mxu0 }
  0xec   : > { %v1102_v19 = vadd.f32 %v1101_v16, %v1088_v13  ;;  %v1115_v22 = vpop.f32.mrf.mxu1 }
  0xee   : > { %v1116_v26 = vadd.f32 %v1115_v22, %v1102_v19 }
  0xf3   : > { %v1129_v27 = vpop.f32.mrf.mxu2  ;;  %v1103_v32 = vpop.f32.mrf.mxu0 }
  0xf4   : > { %v1130_v30 = vadd.f32 %v1129_v27, %v1116_v26  ;;  %v1143_v31 = vpop.f32.mrf.mxu3  ;;  %v1104_v37 = vadd.f32 %v1103_v32, %v1090_v28  ;;  %v1117_v40 = vpop.f32.mrf.mxu1  ;;  %v2408_v28 = vld [vmem:[%s3273_s4] ss:$0 sm:$0xff] }
  0xf6   : > { %v1144_v36 = vadd.f32 %v1143_v31, %v1130_v30  ;;  %v1118_v42 = vadd.f32 %v1117_v40, %v1104_v37 }
  0xf8   : > { %v3128_v38 = vmax.f32 %v1144_v36, 0.0 }
  0xfa   : > { %v1153_v44 = vmul.f32 %v3128_v38, %v3128_v38 }
  0xfb   : > { %v1131_v45 = vpop.f32.mrf.mxu2 }
  0xfc   : > { %v1132_v46 = vadd.f32 %v1131_v45, %v1118_v42  ;;  %v1156_v47 = vadd.f32 %v1153_v44, %v1152_v43  ;;  %v1145_v48 = vpop.f32.mrf.mxu3 }
  0xfe   : > { %v1146_v50 = vadd.f32 %v1145_v48, %v1132_v46  ;;  %1157 = vadd.xlane.f32.xlu0 %v1156_v47 }
 0x100   : > { %v3136_v51 = vmax.f32 %v1146_v50, 0.0 }
 0x102   : > { %v1155_v53 = vmul.f32 %v3136_v51, %v3136_v51 }
 0x104   : > { %v1159_v54 = vadd.f32 %v1155_v53, %v1154_v52 }
 0x106   : > { %1160 = vadd.xlane.f32.xlu0 %v1159_v54  ;;  %v2445_v54 = vmov 0.0  }
 0x107   : > { %361 = vst [vmem:[%s3201_s10] sm:$0x1] %v2445_v54 }
 0x171   : > { %v1158_v3 = vpop.xlane.xlu0 %1157 }
 0x172   : > { %v1162_v35 = vmax.f32 %v1158_v3, 1e-24 }
 0x174   : > { %2409 = vrsqrt.f32 %v1162_v35  ;;  %vm1170_vm1 = vweird.f32 %v1162_v35 }
 0x179   : > { %v1161_v4 = vpop.xlane.xlu0 %1160 }
 0x17a   : > { %v2410_v39 = vpop.eup %2409  ;;  %v1163_v5 = vmax.f32 %v1161_v4, 1e-24 }
 0x17b   : > { %v1165_v6 = vmul.f32 %v2410_v39, %v1162_v35  ;;  %vm1171_vm0 = vweird.f32 %v2410_v39 }
 0x17c   : > { %2411 = vrsqrt.f32 %v1163_v5  ;;  %vm1172_vm3 = vmor %vm1170_vm1, %vm1171_vm0  ;;  %vm1180_vm4 = vweird.f32 %v1163_v5 }
 0x17d   : > { %v1166_v7 = vmul.f32 %v2410_v39, %v1165_v6 }
 0x17f   : > { %v1167_v8 = vmul.f32 0.5, %v1166_v7 }
 0x181   : > { %v1168_v10 = vsub.f32 1.5, %v1167_v8 }
 0x182   : > { %v2412_v9 = vpop.eup %2411 }
 0x183   : > { %v1175_v11 = vmul.f32 %v2412_v9, %v1163_v5  ;;  %v1169_v13 = vmul.f32 %v2410_v39, %v1168_v10  ;;  %vm1181_vm2 = vweird.f32 %v2412_v9 }
 0x184   : > { %vm1182_vm5 = vmor %vm1180_vm4, %vm1181_vm2 }
 0x185   : > { %v1176_v12 = vmul.f32 %v2412_v9, %v1175_v11  ;;  %v1173_v17 = vsel %vm1172_vm3, %v2410_v39, %v1169_v13  ;;  %v1621_v39 = vld [vmem:[%s3201_s10] sm:$0x1] }
 0x186   : > { %v1185_v22 = vmul.f32 %v1173_v17, %v3128_v38  ;;  %v1184_v24 = vmul.f32 %v1173_v17, %v3126_v33 }
 0x187   : > { %v1177_v14 = vmul.f32 0.5, %v1176_v12 }
 0x189   : > { %v1178_v16 = vsub.f32 1.5, %v1177_v14 }
 0x18b   : > { %v1179_v18 = vmul.f32 %v2412_v9, %v1178_v16 }
 0x18d   : > { %v1183_v19 = vsel %vm1182_vm5, %v2412_v9, %v1179_v18 }
 0x18e   : > { %v1187_v23 = vmul.f32 %v1183_v19, %v3136_v51  ;;  %v1186_v25 = vmul.f32 %v1183_v19, %v3134_v49 }
 0x190   : > { %v1189_v26 = vpack.c.bf16 %v1187_v23, %v1185_v22  ;;  %v1188_v27 = vpack.c.bf16 %v1186_v25, %v1184_v24 }
 0x192   : > { %1344 = vmatmul.bf16.vlgmr.msrb.gmra.mxu1 %v1189_v26  ;;  %1330 = vmatmul.bf16.vlgmr.msrb.gmra.mxu0 %v1188_v27 }
 0x193   : > { %1395 = vxpose.binary.xlu1.c.b16.start.end [1/2] (short) %v1189_v26, %v1188_v27, 128 }
 0x20f   : > { %v1331_v30 = vpop.f32.mrf.mxu0  ;;  %v1345_v31 = vpop.f32.mrf.mxu1 }
 0x210   : > { %v1332_v32 = vadd.f32 %v2408_v28, %v1331_v30 }
 0x212   : > { %v1346_v34 = vadd.f32 %v1345_v31, %v1332_v32 }
 0x214   : > { %v1350_v46 = vmul.f32 1.442695, %v1346_v34 }
 0x217   : > { %v1333_v36 = vpop.f32.mrf.mxu0  ;;  %v1347_v38 = vpop.f32.mrf.mxu1 }
 0x218   : > { %v1334_v37 = vadd.f32 %v2408_v28, %v1333_v36 }
 0x21a   : > { %v1348_v40 = vadd.f32 %v1347_v38, %v1334_v37 }
 0x21c   : > { %v1352_v33 = vmul.f32 1.442695, %v1348_v40 }
 0x21e   : > { %2413 = vpow2.f32 %v1352_v33 }
 0x21f   : > { %2415 = vpow2.f32 %v1350_v46 }
 0x224   : > { %v2414_v41 = vpop.eup %2413 }
 0x225   : > { %1356 = vadd.xlane.f32.xlu2 %v2414_v41  ;;  %v2416_v48 = vpop.eup %2415 }
 0x23f   : > { %v1403_v42 = vpop.trf.xlu1 }
 0x247   : > { %v1404_v43 = vpop.trf.xlu1 }
 0x24f   : > { %v1405_v44 = vpop.trf.xlu1 }
 0x257   : > { %v1406_v45 = vpop.trf.xlu1 }
 0x25f   : > { %v1407_v47 = vpop.trf.xlu1 }
 0x263   : > { %1354 = vadd.xlane.f32.xlu1 %v2416_v48 }
 0x267   : > { %v1408_v49 = vpop.trf.xlu1 }
 0x26f   : > { %v1409_v50 = vpop.trf.xlu1 }
 0x277   : > { %v1410_v51 = vpop.trf.xlu1 }
 0x27f   : > { %v1411_v52 = vpop.trf.xlu1 }
 0x287   : > { %v1412_v53 = vpop.trf.xlu1 }
 0x28f   : > { %v1413_v55 = vpop.trf.xlu1 }
 0x297   : > { %v1414_v56 = vpop.trf.xlu1 }
 0x298   : > { %v1357_v59 = vpop.xlane.xlu2 %1356 }
 0x299   : > { %2417 = vrcp.f32 %v1357_v59 }
 0x29f   : > { %v1415_v15 = vpop.trf.xlu1  ;;  %v2418_v61 = vpop.eup %2417 }
 0x2a0   : > { %v1361_v63 = vmul.f32 %v2418_v61, %v2414_v41 }
 0x2a7   : > { %v1416_v57 = vpop.trf.xlu1 }
 0x2af   : > { %v1417_v58 = vpop.trf.xlu1 }
 0x2b7   : > { %v1418_v20 = vpop.trf.xlu1 }
 0x2d6   : > { %v1355_v60 = vpop.xlane.xlu1 %1354 }
 0x2d7   : > { %2419 = vrcp.f32 %v1355_v60 }
 0x2dd   : > { %v2420_v62 = vpop.eup %2419 }
 0x2de   : > { %v1360_v0 = vmul.f32 %v2420_v62, %v2416_v48 }
 0x2e0   : > { %v1622_v1 = vadd.f32 %v1361_v63, %v1360_v0  ;;  %v1394_v21 = vpack.c.bf16 %v1361_v63, %v1360_v0 }
 0x2e2   : > { %v1623_v2 = vrot.slane %v1622_v1, 4  ;;  %1475 = vmatpush.bf16.msra.mxu0 %v1394_v21  ;;  %2378 = vmatpush.bf16.msra.mxu1 %v1394_v21 }
 0x2e3   : > { %2379 = vmatpush.bf16.msrb.mxu2 %v1394_v21  ;;  %2380 = vmatpush.bf16.msrb.mxu3 %v1394_v21 }
 0x2e4   : > { %v1624_v29 = vadd.f32 %v1623_v2, %v1622_v1 }
 0x2e5   : > { %2241 = vmatmul.msk.bf16.vlgmr.msra.gmra.mxu0 %vm1419_vm6, %v1403_v42  ;;  %2244 = vmatmul.msk.bf16.vlgmr.msra.gmra.mxu1 %vm1419_vm6, %v1409_v50 }
 0x2e6   : > { %v1625_v3 = vrot.slane %v1624_v29, 2  ;;  %2247 = vmatmul.msk.bf16.vlgmr.msrb.gmra.mxu2 %vm1419_vm6, %v1415_v15  ;;  %2252 = vmatmul.msk.bf16.vlgmr.msrb.gmra.mxu3 %vm1419_vm6, %v1410_v51 }
 0x2e8   : > { %v1626_v35 = vadd.f32 %v1625_v3, %v1624_v29 }
 0x2ea   : > { %v1627_v4 = vrot.slane %v1626_v35, 1 }
 0x2ec   : > { %v1628_v5 = vadd.f32 %v1627_v4, %v1626_v35 }
 0x2ee   : > { %v1629_v6 = vadd.f32 %v1628_v5, %v1621_v39 }
 0x2f0   : > { %1630 = vst [vmem:[%s3201_s10] sm:$0x1] %v1629_v6 }
 0x2f5   : > { %2242 = vmatmul.msk.bf16.gmra.mxu0 %vm1419_vm6, %v1405_v44  ;;  %2245 = vmatmul.msk.bf16.gmra.mxu1 %vm1419_vm6, %v1411_v52 }
 0x2f6   : > { %2248 = vmatmul.msk.bf16.gmra.mxu2 %vm1419_vm6, %v1417_v58  ;;  %2253 = vmatmul.msk.bf16.gmra.mxu3 %vm1419_vm6, %v1412_v53 }
 0x305   : > { %2243 = vmatmul.msk.bf16.gmra.mxu0 %vm1419_vm6, %v1407_v47  ;;  %2246 = vmatmul.msk.bf16.gmra.mxu1 %vm1419_vm6, %v1413_v55 }
 0x306   : > { %2249 = vmatmul.msk.bf16.gmra.mxu2 %vm1419_vm6, %v1404_v43  ;;  %2254 = vmatmul.msk.bf16.gmra.mxu3 %vm1419_vm6, %v1414_v56 }
 0x316   : > { %2250 = vmatmul.msk.bf16.gmra.mxu2 %vm1419_vm6, %v1406_v45  ;;  %2255 = vmatmul.msk.bf16.gmra.mxu3 %vm1419_vm6, %v1416_v57 }
 0x326   : > { %2251 = vmatmul.msk.bf16.gmra.mxu2 %vm1419_vm6, %v1408_v49  ;;  %2256 = vmatmul.msk.bf16.gmra.mxu3 %vm1419_vm6, %v1418_v20 }
 0x362   : > { %v1477_v7 = vpop.f32.mrf.mxu0  ;;  %v1492_v8 = vpop.f32.mrf.mxu1 }
 0x363   : > { %1589 = vst [vmem:[%s3226_s14] sm:$0xff] %v1477_v7 }
 0x364   : > { %1595 = vst [vmem:[%s3226_s14 + $0x30] sm:$0xff] %v1492_v8 }
 0x369   : > { %v1507_v9 = vpop.f32.mrf.mxu2  ;;  %v1532_v10 = vpop.f32.mrf.mxu3 }
 0x36a   : > { %v1479_v11 = vpop.f32.mrf.mxu0  ;;  %v1494_v12 = vpop.f32.mrf.mxu1  ;;  %1601 = vst [vmem:[%s3226_s14 + $0x60] sm:$0xff] %v1507_v9 }
 0x36b   : > { %1611 = vst [vmem:[%s3226_s14 + $0xb0] sm:$0xff] %v1532_v10 }
 0x36c   : > { %1590 = vst [vmem:[%s3226_s14 + $0x8] sm:$0xff] %v1479_v11 }
 0x36d   : > { %1596 = vst [vmem:[%s3226_s14 + $0x38] sm:$0xff] %v1494_v12 }
 0x371   : > { %v1509_v13 = vpop.f32.mrf.mxu2  ;;  %v1534_v14 = vpop.f32.mrf.mxu3 }
 0x372   : > { %v1482_v16 = vpop.f32.mrf.mxu0  ;;  %v1497_v17 = vpop.f32.mrf.mxu1  ;;  %1602 = vst [vmem:[%s3226_s14 + $0x68] sm:$0xff] %v1509_v13 }
 0x373   : > { %1612 = vst [vmem:[%s3226_s14 + $0xb8] sm:$0xff] %v1534_v14 }
 0x374   : > { %1591 = vst [vmem:[%s3226_s14 + $0x10] sm:$0xff] %v1482_v16 }
 0x375   : > { %1597 = vst [vmem:[%s3226_s14 + $0x40] sm:$0xff] %v1497_v17 }
 0x379   : > { %v1512_v18 = vpop.f32.mrf.mxu2  ;;  %v1537_v19 = vpop.f32.mrf.mxu3 }
 0x37a   : > { %v1484_v22 = vpop.f32.mrf.mxu0  ;;  %v1499_v23 = vpop.f32.mrf.mxu1  ;;  %1603 = vst [vmem:[%s3226_s14 + $0x70] sm:$0xff] %v1512_v18 }
 0x37b   : > { %1613 = vst [vmem:[%s3226_s14 + $0xc0] sm:$0xff] %v1537_v19 }
 0x37c   : > { %1592 = vst [vmem:[%s3226_s14 + $0x18] sm:$0xff] %v1484_v22 }
 0x37d   : > { %1598 = vst [vmem:[%s3226_s14 + $0x48] sm:$0xff] %v1499_v23 }
 0x381   : > { %v1514_v24 = vpop.f32.mrf.mxu2  ;;  %v1539_v25 = vpop.f32.mrf.mxu3 }
 0x382   : > { %v1487_v26 = vpop.f32.mrf.mxu0  ;;  %v1502_v27 = vpop.f32.mrf.mxu1  ;;  %1604 = vst [vmem:[%s3226_s14 + $0x78] sm:$0xff] %v1514_v24 }
 0x383   : > { %1614 = vst [vmem:[%s3226_s14 + $0xc8] sm:$0xff] %v1539_v25 }
 0x384   : > { %1593 = vst [vmem:[%s3226_s14 + $0x20] sm:$0xff] %v1487_v26 }
 0x385   : > { %1599 = vst [vmem:[%s3226_s14 + $0x50] sm:$0xff] %v1502_v27 }
 0x389   : > { %v1517_v28 = vpop.f32.mrf.mxu2  ;;  %v1542_v30 = vpop.f32.mrf.mxu3 }
 0x38a   : > { %v1489_v31 = vpop.f32.mrf.mxu0  ;;  %v1504_v32 = vpop.f32.mrf.mxu1  ;;  %1605 = vst [vmem:[%s3226_s14 + $0x80] sm:$0xff] %v1517_v28 }
 0x38b   : > { %1615 = vst [vmem:[%s3226_s14 + $0xd0] sm:$0xff] %v1542_v30 }
 0x38c   : > { %1594 = vst [vmem:[%s3226_s14 + $0x28] sm:$0xff] %v1489_v31 }
 0x38d   : > { %1600 = vst [vmem:[%s3226_s14 + $0x58] sm:$0xff] %v1504_v32 }
 0x391   : > { %v1519_v34 = vpop.f32.mrf.mxu2  ;;  %v1544_v36 = vpop.f32.mrf.mxu3 }
 0x392   : > { %1606 = vst [vmem:[%s3226_s14 + $0x88] sm:$0xff] %v1519_v34 }
 0x393   : > { %1616 = vst [vmem:[%s3226_s14 + $0xd8] sm:$0xff] %v1544_v36 }
 0x399   : > { %v1522_v37 = vpop.f32.mrf.mxu2  ;;  %v1547_v38 = vpop.f32.mrf.mxu3 }
 0x39a   : > { %1607 = vst [vmem:[%s3226_s14 + $0x90] sm:$0xff] %v1522_v37 }
 0x39b   : > { %1617 = vst [vmem:[%s3226_s14 + $0xe0] sm:$0xff] %v1547_v38 }
 0x3a1   : > { %v1524_v40 = vpop.f32.mrf.mxu2  ;;  %v1549_v33 = vpop.f32.mrf.mxu3 }
 0x3a2   : > { %1608 = vst [vmem:[%s3226_s14 + $0x98] sm:$0xff] %v1524_v40 }
 0x3a3   : > { %1618 = vst [vmem:[%s3226_s14 + $0xe8] sm:$0xff] %v1549_v33 }
 0x3a9   : > { %v1527_v41 = vpop.f32.mrf.mxu2  ;;  %v1552_v42 = vpop.f32.mrf.mxu3 }
 0x3aa   : > { %1609 = vst [vmem:[%s3226_s14 + $0xa0] sm:$0xff] %v1527_v41 }
 0x3ab   : > { %1619 = vst [vmem:[%s3226_s14 + $0xf0] sm:$0xff] %v1552_v42 }
 0x3b1   : > { %v1529_v43 = vpop.f32.mrf.mxu2  ;;  %v1554_v44 = vpop.f32.mrf.mxu3 }
 0x3b2   : > { %1610 = vst [vmem:[%s3226_s14 + $0xa8] sm:$0xff] %v1529_v43 }
 0x3b3   : > { %1620 = vst [vmem:[%s3226_s14 + $0xf8] sm:$0xff] %v1554_v44 }
 0x3b4 PF: > { %s17_s23 = sadd.s32 1, %s2443_s23   ;;  %s3276_s21 = smov %s2439_s22 }
 0x3b5   : > { %p14_p5 = scmp.ge.s32.totalorder %s17_s23, 4   ;;  %s3277_s22 = smov %s3279_s24 }
 0x3b7   :  { %16 = sbr.rel (!%p14_p5) target bundleno = 2 (0x2), region = 86 }

</bundles_post_ra>
